<compile_context>
chip_gen: v7x
topology: tpu7x:2x2x1
jax: 0.10.0
libtpu: 0.0.40
codegen_flags: <defaults>
</compile_context>

<pallas_src>
import jax
import jax.numpy as jnp
from jax.experimental import pallas as pl
from jax.experimental.pallas import tpu as pltpu


def _round_up(a, b):
    return ((a + b - 1) // b) * b


def _default_vmem_limit():
    """~75% of physical per-core VMEM (96 MiB v5e/v6e, 48 MiB v7x)."""
    cap = None
    try:
        cap = getattr(pltpu.get_tpu_info(), "vmem_capacity_bytes", None)
    except Exception:
        cap = None
    if not cap:
        cap = 64 * 1024 * 1024  # conservative floor (interpret / unknown chip)
    return (int(cap) * 3) // 4


def _softmax_store(logits, o_ref):
    """Softmax over the lane axis of `logits` (f32) and store into o_ref."""
    m = jnp.max(logits, axis=-1, keepdims=True)
    e = jnp.exp(logits - m)
    denom = jnp.sum(e, axis=-1, keepdims=True)
    if o_ref.dtype == jnp.float32:
        inv = 1.0 / denom                         # exact: rows sum to 1 in f32
    else:
        inv = pl.reciprocal(denom, approx=True)   # EUP vrcp ok for bf16 output
    o_ref[...] = (e * inv).astype(o_ref.dtype)


def _final_layer_kernel_fused(x_ref, w_ref, b_ref, o_ref):
    # Single contraction step (tk == E): no accumulator round-trip at all.
    x = x_ref[...].astype(w_ref.dtype)            # in-kernel cast (MXU operand)
    logits = jnp.dot(x, w_ref[...], preferred_element_type=jnp.float32)
    logits = logits + b_ref[...]                  # bias stays f32
    _softmax_store(logits, o_ref)


def _final_layer_kernel_acc(x_ref, w_ref, b_ref, o_ref, acc_ref):
    # K-tiled path: f32 accumulator scratch, bias folded into the init.
    k = pl.program_id(1)

    @pl.when(k == 0)
    def _init():
        acc_ref[...] = jnp.broadcast_to(b_ref[...], acc_ref.shape)

    acc_ref[...] += jnp.dot(x_ref[...].astype(w_ref.dtype), w_ref[...],
                            preferred_element_type=jnp.float32)

    @pl.when(k == pl.num_programs(1) - 1)
    def _finalize():
        _softmax_store(acc_ref[...], o_ref)


def prepare_params(weight_ev, bias, *, compute_dtype=jnp.bfloat16):
    """One-time parameter prep (call at init, NOT per forward call).

    weight_ev: (E, V) — weight stored pre-transposed (PyTorch (V, E).T once).
    bias:      (V,)

    Returns (w_prepped (E, V_pad) compute_dtype, b_prepped (1, V_pad) f32, V).
    Padded vocab columns get bias = -1e30 (kept in f32!) so exp underflows to
    exactly 0 and they never influence the softmax.
    """
    E, V = weight_ev.shape
    V_pad = _round_up(V, 128)                     # lane-dense output stores
    w = weight_ev
    b = bias.astype(jnp.float32)
    if V_pad != V:
        w = jnp.pad(w, ((0, 0), (0, V_pad - V)))
        b = jnp.pad(b, (0, V_pad - V), constant_values=-1e30)
    return w.astype(compute_dtype), b.reshape(1, V_pad), V


def final_layer_forward(x, w_prepped, b_prepped, vocab_size=None, *,
                        tm=None, tk=None, out_dtype=None,
                        vmem_limit_bytes=None):
    """FinalLayer forward: softmax(x @ W + b, axis=-1).

    x:         (..., E) in its native dtype (cast to compute dtype in-kernel).
    w_prepped: (E, V_pad) compute dtype, from prepare_params.
    b_prepped: (1, V_pad) f32, from prepare_params.
    """
    *batch_dims, E = x.shape
    assert w_prepped.shape[0] == E, "weight must be stored as (E, V_pad)"
    V_pad = w_prepped.shape[1]
    assert b_prepped.shape == (1, V_pad)
    V = V_pad if vocab_size is None else vocab_size

    tokens = 1
    for d in batch_dims:
        tokens *= d
    out_dtype = x.dtype if out_dtype is None else out_dtype

    # ---- tiling -------------------------------------------------------------
    if tm is None:
        # Bigger row tiles amortize per-step overhead; shrink as the per-row
        # V_pad-wide footprint (out + acc, f32) grows so we stay inside VMEM.
        tm = 512 if V_pad <= 2048 else (256 if V_pad <= 8192 else 128)
    tm = max(8, (tm // 8) * 8)
    tm = min(tm, _round_up(tokens, 8))            # don't over-tile tiny inputs

    if tk is None:
        tk = E                                    # keep full weight resident
    assert E % tk == 0, "tk must divide E"
    n_k = E // tk
    if n_k > 1:
        # 128 ok on v5e (4x128^2 MXU); prefer multiples of 256 on v6e/v7x.
        assert tk % 128 == 0, "partial contraction tiles must be lane-aligned"

    if vmem_limit_bytes is None:
        vmem_limit_bytes = _default_vmem_limit()

    x2d = x.reshape(tokens, E)                    # native dtype, no host cast
    n_rows = pl.cdiv(tokens, tm)                  # ragged tail handled by Pallas

    const_buf = pl.Buffered(1)                    # single-buffer constant blocks

    if n_k == 1:
        grid = (n_rows,)
        in_specs = [
            pl.BlockSpec((tm, E), lambda i: (i, 0)),                         # x
            pl.BlockSpec((E, V_pad), lambda i: (0, 0), pipeline_mode=const_buf),
            pl.BlockSpec((1, V_pad), lambda i: (0, 0), pipeline_mode=const_buf),
        ]
        out_specs = pl.BlockSpec((tm, V_pad), lambda i: (i, 0))
        scratch = []
        kernel = _final_layer_kernel_fused
        dims = ("parallel",)
    else:
        grid = (n_rows, n_k)
        in_specs = [
            pl.BlockSpec((tm, tk), lambda i, k: (i, k)),                     # x
            pl.BlockSpec((tk, V_pad), lambda i, k: (k, 0)),                  # W
            pl.BlockSpec((1, V_pad), lambda i, k: (0, 0), pipeline_mode=const_buf),
        ]
        out_specs = pl.BlockSpec((tm, V_pad), lambda i, k: (i, 0))
        scratch = [pltpu.VMEM((tm, V_pad), jnp.float32)]
        kernel = _final_layer_kernel_acc
        dims = ("parallel", "arbitrary")

    out = pl.pallas_call(
        kernel,
        out_shape=jax.ShapeDtypeStruct((tokens, V_pad), out_dtype),
        grid_spec=pltpu.PrefetchScalarGridSpec(
            num_scalar_prefetch=0,
            grid=grid,
            in_specs=in_specs,
            out_specs=out_specs,
            scratch_shapes=scratch,
        ),
        compiler_params=pltpu.CompilerParams(
            dimension_semantics=dims,
            vmem_limit_bytes=vmem_limit_bytes),
    )(x2d, w_prepped, b_prepped)

    out = out[:, :V]
    return out.reshape(*batch_dims, V)


def init_params(key, embed_size, vocab_size):
    """nn.Linear-style uniform(-1/sqrt(E), 1/sqrt(E)) init, weight in (E, V)."""
    kw, kb = jax.random.split(key)
    bound = 1.0 / (embed_size ** 0.5)
    weight_ev = jax.random.uniform(kw, (embed_size, vocab_size),
                                   minval=-bound, maxval=bound,
                                   dtype=jnp.float32)
    bias = jax.random.uniform(kb, (vocab_size,),
                              minval=-bound, maxval=bound, dtype=jnp.float32)
    return weight_ev, bias


if __name__ == "__main__":
    # Small demo shapes; V=100 deliberately not a multiple of 128 to exercise
    # the vocab-padding / masking path.
    B, S, E, V = 2, 8, 32, 100
    key = jax.random.PRNGKey(0)
    kx, kp, kx2, kp2 = jax.random.split(key, 4)

    x = jax.random.normal(kx, (B, S, E), dtype=jnp.float32)
    weight_ev, bias = init_params(kp, E, V)
    w_p, b_p, _ = prepare_params(weight_ev, bias)       # one-time prep

    probs = final_layer_forward(x, w_p, b_p, vocab_size=V)
    jax.block_until_ready(probs)

    # Reference matching the kernel numerics (bf16 operands, f32 accumulate).
    logits_bf16 = jnp.dot(x.reshape(-1, E).astype(jnp.bfloat16),
                          weight_ev.astype(jnp.bfloat16),
                          preferred_element_type=jnp.float32) + bias
    ref = jax.nn.softmax(logits_bf16, axis=-1).reshape(B, S, V)
    # Full-f32 reference (what the PyTorch module computes).
    ref_f32 = jax.nn.softmax(x @ weight_ev + bias, axis=-1)

    assert probs.shape == (B, S, V)
    assert jnp.allclose(jnp.sum(probs, axis=-1), 1.0, atol=1e-4)
    assert jnp.allclose(probs, ref, atol=2e-3)
    assert jnp.allclose(probs, ref_f32, atol=1e-2)

    # Also exercise the K-tiled accumulator path (tk < E).
    E2 = 256
    x2 = jax.random.normal(kx2, (B, S, E2), dtype=jnp.float32)
    w2, b2 = init_params(kp2, E2, V)
    w2_p, b2_p, _ = prepare_params(w2, b2)
    probs2 = final_layer_forward(x2, w2_p, b2_p, vocab_size=V, tk=128)
    jax.block_until_ready(probs2)
    ref2 = jax.nn.softmax(
        jnp.dot(x2.reshape(-1, E2).astype(jnp.bfloat16),
                w2.astype(jnp.bfloat16),
                preferred_element_type=jnp.float32) + b2,
        axis=-1).reshape(B, S, V)
    assert probs2.shape == (B, S, V)
    assert jnp.allclose(jnp.sum(probs2, axis=-1), 1.0, atol=1e-4)
    assert jnp.allclose(probs2, ref2, atol=2e-3)

    print("KERNEL_OK")
</pallas_src>

<mosaic_0001>
module attributes {stable_mosaic.version = 11 : i64} {
  func.func @_final_layer_kernel_fused(%arg0: i32, %arg1: memref<16x32xf32, #tpu.memory_space<vmem>>, %arg2: memref<32x128xbf16, #tpu.memory_space<vmem>>, %arg3: memref<1x128xf32, #tpu.memory_space<vmem>>, %arg4: memref<16x128xf32, #tpu.memory_space<vmem>>) attributes {dimension_semantics = [#tpu.dimension_semantics<parallel>], iteration_bounds = array<i64: 1>, scalar_prefetch = 0 : i64, scratch_operands = 0 : i64, tpu.core_type = #tpu.core_type<tc>, window_params = [{transform_indices = @transform_0, window_bounds = array<i64: 16, 32>}, {pipeline_mode = #tpu.pipeline_mode<synchronous>, transform_indices = @transform_1, window_bounds = array<i64: 32, 128>}, {pipeline_mode = #tpu.pipeline_mode<synchronous>, transform_indices = @transform_2, window_bounds = array<i64: 1, 128>}, {transform_indices = @transform_3, window_bounds = array<i64: 16, 128>}]} {
    %c0 = arith.constant 0 : index
    %c0_0 = arith.constant 0 : index
    %0 = vector.load %arg1[%c0, %c0_0] : memref<16x32xf32, #tpu.memory_space<vmem>>, vector<16x32xf32>
    %1 = arith.truncf %0 : vector<16x32xf32> to vector<16x32xbf16>
    %c0_1 = arith.constant 0 : index
    %c0_2 = arith.constant 0 : index
    %2 = vector.load %arg2[%c0_1, %c0_2] : memref<32x128xbf16, #tpu.memory_space<vmem>>, vector<32x128xbf16>
    %cst = arith.constant dense<0.000000e+00> : vector<16x128xf32>
    %3 = tpu.matmul %1, %2, %cst {dimension_numbers = #tpu.dot_dimension_numbers<[1], [0], [0], [1], [0, 0, 1, 1], [], []>} : vector<16x32xbf16>, vector<32x128xbf16>, vector<16x128xf32> -> vector<16x128xf32>
    %c0_3 = arith.constant 0 : index
    %c0_4 = arith.constant 0 : index
    %4 = vector.load %arg3[%c0_3, %c0_4] : memref<1x128xf32, #tpu.memory_space<vmem>>, vector<1x128xf32>
    %5 = vector.broadcast %4 : vector<1x128xf32> to vector<16x128xf32>
    %6 = arith.addf %3, %5 : vector<16x128xf32>
    %cst_5 = arith.constant dense<0xFF800000> : vector<16xf32>
    %7 = vector.multi_reduction <maximumf>, %6, %cst_5 [1] : vector<16x128xf32> to vector<16xf32>
    %8 = vector.shape_cast %7 : vector<16xf32> to vector<16x1xf32>
    %9 = vector.broadcast %8 : vector<16x1xf32> to vector<16x128xf32>
    %10 = arith.subf %6, %9 : vector<16x128xf32>
    %11 = math.exp %10 : vector<16x128xf32>
    %cst_6 = arith.constant dense<0.000000e+00> : vector<16xf32>
    %12 = vector.multi_reduction <add>, %11, %cst_6 [1] : vector<16x128xf32> to vector<16xf32>
    %13 = vector.shape_cast %12 : vector<16xf32> to vector<16x1xf32>
    %cst_7 = arith.constant 1.000000e+00 : f32
    %14 = vector.broadcast %cst_7 : f32 to vector<16x1xf32>
    %15 = arith.divf %14, %13 : vector<16x1xf32>
    %16 = vector.broadcast %15 : vector<16x1xf32> to vector<16x128xf32>
    %17 = arith.mulf %11, %16 : vector<16x128xf32>
    %c0_8 = arith.constant 0 : index
    %c0_9 = arith.constant 0 : index
    %18 = vector.load %arg4[%c0_8, %c0_9] : memref<16x128xf32, #tpu.memory_space<vmem>>, vector<16x128xf32>
    tpu.vector_store %arg4[%c0_8, %c0_9], %17 {strides = array<i32>} : memref<16x128xf32, #tpu.memory_space<vmem>>, vector<16x128xf32>,
    return
  }
  func.func @transform_0(%arg0: i32) -> (i32, i32) {
    %c0_i32 = arith.constant 0 : i32
    %c0_i32_0 = arith.constant 0 : i32
    return %arg0, %c0_i32 : i32, i32
  }
  func.func @transform_1(%arg0: i32) -> (i32, i32) {
    %c0_i32 = arith.constant 0 : i32
    %c0_i32_0 = arith.constant 0 : i32
    %c0_i32_1 = arith.constant 0 : i32
    return %c0_i32, %c0_i32_0 : i32, i32
  }
  func.func @transform_2(%arg0: i32) -> (i32, i32) {
    %c0_i32 = arith.constant 0 : i32
    %c0_i32_0 = arith.constant 0 : i32
    %c0_i32_1 = arith.constant 0 : i32
    return %c0_i32, %c0_i32_0 : i32, i32
  }
  func.func @transform_3(%arg0: i32) -> (i32, i32) {
    %c0_i32 = arith.constant 0 : i32
    %c0_i32_0 = arith.constant 0 : i32
    return %arg0, %c0_i32 : i32, i32
  }
}

</mosaic_0001>

<bundles_post_ra>
// kernel: tpu_custom_call.1
= control target key start
LH: loop header
LB: loop body
LE: loop exit
PB: predicated region body
PF: predicated region fallthrough
CT: control target
= control target key end

     0   :  { %8 = vsyncpa [#allocation3], 0  ;;  %s335_s0 = inlined_call_operand.hbm [shape: f32[16,32], index: 0, kind: input, shape index: {}]   ;;  %s336_s1 = inlined_call_operand.hbm [shape: bf16[32,128], index: 1, kind: input, shape index: {}]   ;;  %s337_s2 = inlined_call_operand.vmem [shape: f32[1,128], index: 2, kind: input, shape index: {}]   ;;  %s338_s3 = inlined_call_operand.hbm [shape: f32[16,128], index: 3, kind: output, shape index: {}]  }
   0x1   :  { %9 = vsyncpa [#allocation6], 0 }
   0x2   :  { %10 = vsyncpa [#allocation4], 0  ;;  %s261_s12 = smov [#allocation2]   ;;  %s189_s16 = scalar_lea.hbm %s335_s0, 256 }
   0x3   :  { %s16_s13 = sshll.u32 %s261_s12, 4  ;;  %p190_p0 = scmp.ne.s32.totalorder %s335_s0, %s189_s16  ;;  %s17_s13 = int_to_ptr.vmem [resolvable:$true] %s16_s13 }
   0x4   :  { %p193_p1 = scmp.lt.u32.totalorder %s189_s16, %s335_s0 }
   0x6   :  { %p195_p2 = pnand %p193_p1, %p190_p0 }
   0x8   :  { %198 = shalt.err (!%p195_p2)
}
   0x9   :  { %s199_s21 = scalar_lea.vmem %s17_s13, 256  ;;  %p204_p4 = scmp.lt.s32.totalorder %s17_s13, %s17_s13 }
   0xa   :  { %p200_p3 = scmp.ne.s32.totalorder %s17_s13, %s199_s21  ;;  %p205_p5 = scmp.lt.s32.totalorder %s199_s21, %s199_s21 }
   0xc   :  { %p206_p6 = por %p205_p5, %p204_p4 }
   0xe   :  { %p207_p7 = pnand %p206_p6, %p200_p3 }
  0x10   :  { %210 = shalt.err (!%p207_p7)
}
  0x11   :  { %s262_s22 = smov 128   ;;  %s263_s23 = smov 8  }
  0x12   :  { %22 = dma.hbm_to_vmem [thread:$0]  %s335_s0, 256, %s17_s13, [#allocation3], %s262_s22, %s262_s22, %s263_s23  }
  0x13   :  { %s264_s26 = smov [#allocation5]   ;;  %s211_s30 = scalar_lea.hbm %s336_s1, 256 }
  0x14   :  { %s28_s27 = sshll.u32 %s264_s26, 4  ;;  %p212_p8 = scmp.ne.s32.totalorder %s336_s1, %s211_s30  ;;  %s29_s27 = int_to_ptr.vmem [resolvable:$true] %s28_s27 }
  0x15   :  { %p215_p9 = scmp.lt.u32.totalorder %s211_s30, %s336_s1 }
  0x17   :  { %p217_p10 = pnand %p215_p9, %p212_p8 }
  0x19   :  { %220 = shalt.err (!%p217_p10)
}
  0x1a   :  { %s221_s8 = scalar_lea.vmem %s29_s27, 256  ;;  %p226_p12 = scmp.lt.s32.totalorder %s29_s27, %s29_s27 }
  0x1b   :  { %p222_p11 = scmp.ne.s32.totalorder %s29_s27, %s221_s8  ;;  %p227_p13 = scmp.lt.s32.totalorder %s221_s8, %s221_s8 }
  0x1d   :  { %p228_p0 = por %p227_p13, %p226_p12 }
  0x1f   :  { %p229_p1 = pnand %p228_p0, %p222_p11 }
  0x21   :  { %232 = shalt.err (!%p229_p1)
}
  0x22   :  { %s265_s0 = smov 64   ;;  %s266_s9 = smov 4  }
  0x23   :  { %34 = dma.hbm_to_vmem [thread:$0]  %s336_s1, 256, %s29_s27, [#allocation6], %s265_s0, %s265_s0, %s266_s9  }
  0x24   :  { %255 = dma.done.wait [#allocation3], 256  }
  0x25   :  { %256 = vsyncadd [#allocation3], 4294967040 }
  0x26   :  { %257 = dma.done.wait [#allocation6], 256  }
  0x27   :  { %258 = vsyncadd [#allocation6], 4294967040  ;;  %v267_v0 = vmov 0.0   ;;  %vm268_vm0 = vmmov 0   ;;  %v179_v1 = vld [vmem:[#allocation5] sm:$0xff]   ;;  %v180_v2 = vld [vmem:[#allocation5 + $0x8] sm:$0xff]  }
  0x28   :  { %162 = vmatprep.subr.bf16.mxu0 %v267_v0  ;;  %166 = vmatprep.mubr.msk.bf16.mxu0 %vm268_vm0, %v267_v0  ;;  %v44_v3 = vld [vmem:[#allocation2] sm:$0xff]  ;;  %v45_v4 = vld [vmem:[#allocation2 + $0x8] sm:$0xff]  ;;  %vm70_vm1 = vcmask 261120  }
  0x29   :  { %163 = vmatpush3.bf16.msra.mxu0 %v179_v1  ;;  %v46_v5 = vpack.c.bf16 %v45_v4, %v44_v3  ;;  %v155_v6 = vld [vmem:[%s337_s2] ss:$0 sm:$0xff]  ;;  %s269_s2 = smov [#allocation7]  }
  0x2a   :  { %164 = vmatprep.subr.bf16.mxu0 %v267_v0  ;;  %s142_s13 = sshll.u32 %s269_s2, 4  ;;  %s143_s13 = int_to_ptr.vmem [resolvable:$true] %s142_s13 }
  0x2b   :  { %s233_s14 = scalar_lea.vmem %s143_s13, 256  ;;  %p238_p3 = scmp.lt.s32.totalorder %s143_s13, %s143_s13 }
  0x2c   :  { %p234_p2 = scmp.ne.s32.totalorder %s143_s13, %s233_s14  ;;  %p239_p4 = scmp.lt.s32.totalorder %s233_s14, %s233_s14 }
  0x2d   :  { %165 = vmatpush3.bf16.msra.mxu0 %v180_v2 }
  0x2e   :  { %p240_p5 = por %p239_p4, %p238_p3 }
  0x30   :  { %167 = vmatmul.mubr.msk.bf16.vlgmr.msra.gmra.mrb[0].mxu0 %vm70_vm1, %v46_v5  ;;  %p241_p6 = pnand %p240_p5, %p234_p2 }
 0x103   :  { %v108_v7 = vpop.f32.mrb[0].mxu0 }
 0x104   :  { %v109_v8 = vadd.f32 %v155_v6, %v108_v7  ;;  %v168_v9 = vpop.f32.mrb[1].mxu0 }
 0x105   :  { %v111_v10 = vpop.f32.mrb[2].mxu0 }
 0x106   :  { %115 = vmax.xlane.f32.xlu0 %v109_v8  ;;  %v169_v11 = vpop.f32.mrb[3].mxu0  ;;  %v112_v12 = vadd.f32 %v155_v6, %v111_v10 }
 0x10a   :  { %117 = vmax.xlane.f32.xlu0 %v112_v12 }
 0x193   :  { %v116_v13 = vpop.xlane.xlu0 %115 }
 0x194   :  { %v119_v14 = vsub.f32 %v109_v8, %v116_v13 }
 0x196   :  { %v121_v15 = vmul.f32 1.442695, %v119_v14 }
 0x197   :  { %v118_v16 = vpop.xlane.xlu0 %117 }
 0x198   :  { %181 = vpow2.f32 %v121_v15  ;;  %v120_v17 = vsub.f32 %v112_v12, %v118_v16 }
 0x19a   :  { %v123_v18 = vmul.f32 1.442695, %v120_v17 }
 0x19c   :  { %183 = vpow2.f32 %v123_v18 }
 0x1a2   :  { %v182_v19 = vpop.eup %181 }
 0x1a3   :  { %125 = vadd.xlane.f32.xlu1 %v182_v19 }
 0x1a6   :  { %v184_v20 = vpop.eup %183 }
 0x1a7   :  { %127 = vadd.xlane.f32.xlu1 %v184_v20 }
 0x230   :  { %v126_v21 = vpop.xlane.xlu1 %125 }
 0x231   :  { %185 = vrcp.f32 %v126_v21 }
 0x234   :  { %v128_v22 = vpop.xlane.xlu1 %127 }
 0x235   :  { %187 = vrcp.f32 %v128_v22 }
 0x23b   :  { %v186_v23 = vpop.eup %185 }
 0x23c   :  { %v133_v24 = vmul.f32 %v186_v23, %v182_v19 }
 0x23e   :  { %135 = vst [vmem:[#allocation7] sm:$0xff] %v133_v24 }
 0x23f   :  { %v188_v25 = vpop.eup %187 }
 0x240   :  { %v134_v26 = vmul.f32 %v188_v25, %v184_v20 }
 0x242   :  { %136 = vst [vmem:[#allocation7 + $0x8] sm:$0xff] %v134_v26 }
 0x243   :  { %244 = shalt.err (!%p241_p6)
}
 0x244   :  { %s245_s17 = scalar_lea.hbm %s338_s3, 256 }
 0x245   :  { %p246_p7 = scmp.ne.s32.totalorder %s338_s3, %s245_s17  ;;  %p249_p8 = scmp.lt.u32.totalorder %s245_s17, %s338_s3 }
 0x247   :  { %p251_p9 = pnand %p249_p8, %p246_p7 }
 0x249   :  { %254 = shalt.err (!%p251_p9)
}
 0x24a   :  { %148 = dma.vmem_to_hbm [thread:$0]  %s143_s13, 256, %s338_s3, [#allocation4], %s262_s22, %s262_s22, %s263_s23  }
 0x24b   :  { %259 = dma.done.wait [#allocation4], 256  }
 0x24c   :  { %260 = vsyncadd [#allocation4], 4294967040 }
 0x24d   :  { %152 = vsyncpa [#allocation3], 1 }
 0x24e   :  { %153 = vsyncpa [#allocation6], 1 }
 0x24f   :  { %154 = vsyncpa [#allocation4], 1 }

</bundles_post_ra>
